<compile_context>
chip_gen: v6e
topology: v6e:2x2x1
jax: 0.10.0
libtpu: 0.0.40
codegen_flags: <defaults>
</compile_context>

<pallas_src>
import functools

import jax
import jax.numpy as jnp
from jax.experimental import pallas as pl
from jax.experimental.pallas import tpu as pltpu

MID = 64  # width of the inner MLP layer in ODEGRUDrift


def _round_up(x: int, m: int) -> int:
    return (x + m - 1) // m * m


def _drift_kernel(h_ref, w1_ref, b1_ref, w2_ref, b2_ref, out_ref):
    """One batch tile of the drift MLP (natural [batch, hidden] layout).

    h_ref  : [TB, hidden]  f32   (state tile)
    w1_ref : [hidden, 64]  bf16  ([in, out] orientation)
    b1_ref : [1, 64]       f32
    w2_ref : [64, hidden]  bf16
    b2_ref : [1, hidden]   f32
    out_ref: [TB, hidden]  f32
    """
    h_bf = h_ref[...].astype(jnp.bfloat16)
    # z1 = h @ W1^T  -> [TB, 64], f32 accumulation on the MXU.
    z1 = jnp.dot(h_bf, w1_ref[...], preferred_element_type=jnp.float32)
    a = jnp.tanh(z1 + b1_ref[...])  # bias add + tanh in f32 (VPU/EUP)
    # out = tanh(.) @ W2^T + b2 -> [TB, hidden]
    z2 = jnp.dot(a.astype(jnp.bfloat16), w2_ref[...],
                 preferred_element_type=jnp.float32)
    out_ref[...] = (z2 + b2_ref[...]).astype(out_ref.dtype)


@functools.partial(jax.jit, static_argnames=("block_batch",))
def ode_gru_drift(t, h, params, block_batch=None):
    """Pallas implementation of ODEGRUDrift.forward(t, h).

    t: scalar (unused; kept for API parity with the PyTorch module).
    h: [batch, hidden] float32.
    params: dict with w1 [64, hidden] bf16, b1 [64] f32,
                      w2 [hidden, 64] bf16, b2 [hidden] f32
            (PyTorch [out, in] weight orientation).
    """
    del t  # autonomous system: drift ignores time
    batch, hidden = h.shape
    w1, b1, w2, b2 = params["w1"], params["b1"], params["w2"], params["b2"]
    mid = w1.shape[0]

    # Batch tile: largest multiple of 8 that keeps a single tile <= ~8 MiB
    # (so double-buffered in+out tiles fit easily in scoped VMEM), capped
    # at 1024 rows and at the (8-rounded) batch itself.
    if block_batch is None:
        bytes_per_row = hidden * 4
        tb_cap = max(8, ((8 * 1024 * 1024) // bytes_per_row) // 8 * 8)
        tb = min(_round_up(batch, 8), 1024, tb_cap)
    else:
        tb = _round_up(block_batch, 8)
    padded_batch = _round_up(batch, tb)
    n_tiles = padded_batch // tb

    # Pad batch (cheap, rows are independent); keep natural layout otherwise.
    h_p = jnp.pad(h, ((0, padded_batch - batch), (0, 0)))

    # Tiny weight re-orientation to [in, out] so the MXU contracts the last
    # dim of h against the first dim of W (no in-kernel transposes).
    w1_t = w1.astype(jnp.bfloat16).T            # [hidden, 64]
    w2_t = w2.astype(jnp.bfloat16).T            # [64, hidden]
    b1_row = b1.astype(jnp.float32).reshape(1, mid)
    b2_row = b2.astype(jnp.float32).reshape(1, hidden)

    # Advisory cost estimate for XLA's scheduler.
    flops = 4 * padded_batch * hidden * mid                    # two matmuls
    bytes_accessed = (2 * hidden * padded_batch * h.dtype.itemsize  # h in + out
                      + 2 * hidden * mid * 2                        # bf16 weights
                      + (mid + hidden) * 4)                         # f32 biases
    cost = pl.CostEstimate(flops=flops,
                           transcendentals=padded_batch * mid,
                           bytes_accessed=bytes_accessed)

    # Scoped-VMEM budget: double-buffered h/out tiles + resident weights +
    # intermediates, with headroom, clamped for v7x's 64 MiB VMEM.
    tile_bytes = tb * hidden * 4
    mid_bytes = tb * mid * 4
    weight_bytes = 2 * hidden * mid * 2 + (mid + hidden + 2) * 4
    vmem_limit = int(1.5 * (2 * 2 * tile_bytes + 2 * mid_bytes + 2 * weight_bytes))
    vmem_limit = min(max(vmem_limit, 32 * 1024 * 1024), 48 * 1024 * 1024)

    grid_spec = pltpu.PrefetchScalarGridSpec(
        num_scalar_prefetch=0,
        grid=(n_tiles,),
        in_specs=[
            pl.BlockSpec((tb, hidden), lambda i: (i, 0)),     # h: streams per tile
            pl.BlockSpec((hidden, mid), lambda i: (0, 0)),    # W1^T: resident
            pl.BlockSpec((1, mid), lambda i: (0, 0)),         # b1: resident
            pl.BlockSpec((mid, hidden), lambda i: (0, 0)),    # W2^T: resident
            pl.BlockSpec((1, hidden), lambda i: (0, 0)),      # b2: resident
        ],
        out_specs=pl.BlockSpec((tb, hidden), lambda i: (i, 0)),
    )

    out_p = pl.pallas_call(
        _drift_kernel,
        out_shape=jax.ShapeDtypeStruct((padded_batch, hidden), h.dtype),
        grid_spec=grid_spec,
        compiler_params=pltpu.CompilerParams(
            dimension_semantics=("parallel",),
            vmem_limit_bytes=vmem_limit,
        ),
        cost_estimate=cost,
    )(h_p, w1_t, b1_row, w2_t, b2_row)

    return out_p[:batch]


def init_params(hidden_size: int, key):
    """nn.Linear-style init; weights kept in PyTorch [out, in] layout, bf16."""
    k1, k2, k3, k4 = jax.random.split(key, 4)
    bound1 = 1.0 / (hidden_size ** 0.5)   # Linear(hidden, 64): fan_in = hidden
    bound2 = 1.0 / (MID ** 0.5)           # Linear(64, hidden): fan_in = 64
    w1 = jax.random.uniform(k1, (MID, hidden_size), jnp.float32, -bound1, bound1)
    b1 = jax.random.uniform(k2, (MID,), jnp.float32, -bound1, bound1)
    w2 = jax.random.uniform(k3, (hidden_size, MID), jnp.float32, -bound2, bound2)
    b2 = jax.random.uniform(k4, (hidden_size,), jnp.float32, -bound2, bound2)
    return {
        "w1": w1.astype(jnp.bfloat16), "b1": b1,
        "w2": w2.astype(jnp.bfloat16), "b2": b2,
    }


def ref_drift_bf16(h, params):
    """Pure-JAX reference with the same bf16-operand / f32-accum math."""
    z1 = jnp.dot(h.astype(jnp.bfloat16), params["w1"].T,
                 preferred_element_type=jnp.float32) + params["b1"]
    a = jnp.tanh(z1)
    z2 = jnp.dot(a.astype(jnp.bfloat16), params["w2"].T,
                 preferred_element_type=jnp.float32) + params["b2"]
    return z2


if __name__ == "__main__":
    key = jax.random.PRNGKey(0)
    k_param, k_h = jax.random.split(key)

    batch, hidden = 2, 32
    params = init_params(hidden, k_param)
    h = jax.random.normal(k_h, (batch, hidden), jnp.float32)
    t = jnp.float32(0.0)  # unused by the drift

    out = jax.block_until_ready(ode_gru_drift(t, h, params))
    assert out.shape == (batch, hidden)

    # Check against a reference that uses the identical precision path.
    ref = ref_drift_bf16(h, params)
    assert jnp.allclose(out, ref, atol=1e-3, rtol=1e-3), \
        float(jnp.max(jnp.abs(out - ref)))

    # Sanity check against full-f32 math (loose tolerance for bf16 operands).
    ref_f32 = (jnp.tanh(h @ params["w1"].astype(jnp.float32).T + params["b1"])
               @ params["w2"].astype(jnp.float32).T + params["b2"])
    assert jnp.allclose(out, ref_f32, atol=5e-2, rtol=5e-2), \
        float(jnp.max(jnp.abs(out - ref_f32)))

    print("KERNEL_OK")
</pallas_src>

<mosaic_0001>
module attributes {stable_mosaic.version = 11 : i64} {
  func.func @_drift_kernel(%arg0: i32, %arg1: memref<8x32xf32, #tpu.memory_space<vmem>>, %arg2: memref<32x64xbf16, #tpu.memory_space<vmem>>, %arg3: memref<1x64xf32, #tpu.memory_space<vmem>>, %arg4: memref<64x32xbf16, #tpu.memory_space<vmem>>, %arg5: memref<1x32xf32, #tpu.memory_space<vmem>>, %arg6: memref<8x32xf32, #tpu.memory_space<vmem>>) attributes {dimension_semantics = [#tpu.dimension_semantics<parallel>], iteration_bounds = array<i64: 1>, scalar_prefetch = 0 : i64, scratch_operands = 0 : i64, tpu.core_type = #tpu.core_type<tc>, window_params = [{transform_indices = @transform_0, window_bounds = array<i64: 8, 32>}, {pipeline_mode = #tpu.pipeline_mode<synchronous>, transform_indices = @transform_1, window_bounds = array<i64: 32, 64>}, {pipeline_mode = #tpu.pipeline_mode<synchronous>, transform_indices = @transform_2, window_bounds = array<i64: 1, 64>}, {pipeline_mode = #tpu.pipeline_mode<synchronous>, transform_indices = @transform_3, window_bounds = array<i64: 64, 32>}, {pipeline_mode = #tpu.pipeline_mode<synchronous>, transform_indices = @transform_4, window_bounds = array<i64: 1, 32>}, {transform_indices = @transform_5, window_bounds = array<i64: 8, 32>}]} {
    %c0 = arith.constant 0 : index
    %c0_0 = arith.constant 0 : index
    %0 = vector.load %arg1[%c0, %c0_0] : memref<8x32xf32, #tpu.memory_space<vmem>>, vector<8x32xf32>
    %1 = arith.truncf %0 : vector<8x32xf32> to vector<8x32xbf16>
    %c0_1 = arith.constant 0 : index
    %c0_2 = arith.constant 0 : index
    %2 = vector.load %arg2[%c0_1, %c0_2] : memref<32x64xbf16, #tpu.memory_space<vmem>>, vector<32x64xbf16>
    %cst = arith.constant dense<0.000000e+00> : vector<8x64xf32>
    %3 = tpu.matmul %1, %2, %cst {dimension_numbers = #tpu.dot_dimension_numbers<[1], [0], [0], [1], [0, 0, 1, 1], [], []>} : vector<8x32xbf16>, vector<32x64xbf16>, vector<8x64xf32> -> vector<8x64xf32>
    %c0_3 = arith.constant 0 : index
    %c0_4 = arith.constant 0 : index
    %4 = vector.load %arg3[%c0_3, %c0_4] : memref<1x64xf32, #tpu.memory_space<vmem>>, vector<1x64xf32>
    %5 = vector.broadcast %4 : vector<1x64xf32> to vector<8x64xf32>
    %6 = arith.addf %3, %5 : vector<8x64xf32>
    %7 = math.tanh %6 : vector<8x64xf32>
    %8 = arith.truncf %7 : vector<8x64xf32> to vector<8x64xbf16>
    %c0_5 = arith.constant 0 : index
    %c0_6 = arith.constant 0 : index
    %9 = vector.load %arg4[%c0_5, %c0_6] : memref<64x32xbf16, #tpu.memory_space<vmem>>, vector<64x32xbf16>
    %cst_7 = arith.constant dense<0.000000e+00> : vector<8x32xf32>
    %10 = tpu.matmul %8, %9, %cst_7 {dimension_numbers = #tpu.dot_dimension_numbers<[1], [0], [0], [1], [0, 0, 1, 1], [], []>} : vector<8x64xbf16>, vector<64x32xbf16>, vector<8x32xf32> -> vector<8x32xf32>
    %c0_8 = arith.constant 0 : index
    %c0_9 = arith.constant 0 : index
    %11 = vector.load %arg5[%c0_8, %c0_9] : memref<1x32xf32, #tpu.memory_space<vmem>>, vector<1x32xf32>
    %12 = vector.broadcast %11 : vector<1x32xf32> to vector<8x32xf32>
    %13 = arith.addf %10, %12 : vector<8x32xf32>
    %c0_10 = arith.constant 0 : index
    %c0_11 = arith.constant 0 : index
    %14 = vector.load %arg6[%c0_10, %c0_11] : memref<8x32xf32, #tpu.memory_space<vmem>>, vector<8x32xf32>
    tpu.vector_store %arg6[%c0_10, %c0_11], %13 {strides = array<i32>} : memref<8x32xf32, #tpu.memory_space<vmem>>, vector<8x32xf32>,
    return
  }
  func.func @transform_0(%arg0: i32) -> (i32, i32) {
    %c0_i32 = arith.constant 0 : i32
    %c0_i32_0 = arith.constant 0 : i32
    return %arg0, %c0_i32 : i32, i32
  }
  func.func @transform_1(%arg0: i32) -> (i32, i32) {
    %c0_i32 = arith.constant 0 : i32
    %c0_i32_0 = arith.constant 0 : i32
    %c0_i32_1 = arith.constant 0 : i32
    return %c0_i32, %c0_i32_0 : i32, i32
  }
  func.func @transform_2(%arg0: i32) -> (i32, i32) {
    %c0_i32 = arith.constant 0 : i32
    %c0_i32_0 = arith.constant 0 : i32
    %c0_i32_1 = arith.constant 0 : i32
    return %c0_i32, %c0_i32_0 : i32, i32
  }
  func.func @transform_3(%arg0: i32) -> (i32, i32) {
    %c0_i32 = arith.constant 0 : i32
    %c0_i32_0 = arith.constant 0 : i32
    %c0_i32_1 = arith.constant 0 : i32
    return %c0_i32, %c0_i32_0 : i32, i32
  }
  func.func @transform_4(%arg0: i32) -> (i32, i32) {
    %c0_i32 = arith.constant 0 : i32
    %c0_i32_0 = arith.constant 0 : i32
    %c0_i32_1 = arith.constant 0 : i32
    return %c0_i32, %c0_i32_0 : i32, i32
  }
  func.func @transform_5(%arg0: i32) -> (i32, i32) {
    %c0_i32 = arith.constant 0 : i32
    %c0_i32_0 = arith.constant 0 : i32
    return %arg0, %c0_i32 : i32, i32
  }
}

</mosaic_0001>

<bundles_post_ra>
// kernel: ode_gru_drift.1
= control target key start
LH: loop header
LB: loop body
LE: loop exit
PB: predicated region body
PF: predicated region fallthrough
CT: control target
= control target key end

     0   :  { %v228_v0 = vmov 0.0   ;;  %vm229_vm0 = vmmov 0   ;;  %vm46_vm1 = vcmask 261120   ;;  %vm131_vm2 = vcmask 523264   ;;  %s292_s1 = inlined_call_operand.vmem [shape: bf16[32,64], index: 1, kind: input, shape index: {}]   ;;  %s293_s0 = inlined_call_operand.vmem [shape: f32[8,32], index: 0, kind: input, shape index: {}]   ;;  %s294_s3 = inlined_call_operand.vmem [shape: bf16[64,32], index: 3, kind: input, shape index: {}]   ;;  %s295_s2 = inlined_call_operand.vmem [shape: f32[1,64], index: 2, kind: input, shape index: {}]   ;;  %s296_s4 = inlined_call_operand.vmem [shape: f32[1,32], index: 4, kind: input, shape index: {}]   ;;  %s297_s5 = inlined_call_operand.vmem [shape: f32[8,32], index: 5, kind: output, shape index: {}]  }
   0x1   :  { %198 = vmatprep.subr.bf16.mxu0 %v228_v0  ;;  %v220_v1 = vld [vmem:[%s292_s1 + $0x8] sm:$0xff]   ;;  %202 = vmatprep.mubr.msk.bf16.mxu0 %vm229_vm0, %v228_v0  ;;  %v221_v2 = vld [vmem:[%s292_s1] sm:$0xff]   ;;  %v222_v5 = vld [vmem:[%s294_s3 + $0x18] sm:$0xff]  }
   0x2   :  { %206 = vmatprep.subr.bf16.mxu1 %v228_v0  ;;  %214 = vmatprep.mubr.msk.bf16.mxu1 %vm229_vm0, %v228_v0  ;;  %v21_v3 = vld [vmem:[%s293_s0] sm:$0xff]  ;;  %v223_v6 = vld [vmem:[%s294_s3 + $0x10] sm:$0xff]   ;;  %v224_v7 = vld [vmem:[%s294_s3 + $0x8] sm:$0xff]  }
   0x3   :  { %199 = vmatpush3.bf16.msra.mxu0 %v220_v1  ;;  %v22_v4 = vpack.c.bf16 %v21_v3, %v21_v3  ;;  %207 = vmatpush3.bf16.msra.mxu1 %v222_v5  ;;  %v225_v8 = vld [vmem:[%s294_s3] sm:$0xff]  }
   0x4   :  { %200 = vmatprep.subr.bf16.mxu0 %v228_v0  ;;  %208 = vmatprep.subr.bf16.mxu1 %v228_v0  ;;  %v180_v9 = vld [vmem:[%s295_s2] ss:$0 sm:$0xff] }
   0x5   :  { %v184_v17 = vld [vmem:[%s296_s4] ss:$0 sm:$0xff] }
   0x7   :  { %201 = vmatpush3.bf16.msra.mxu0 %v221_v2  ;;  %209 = vmatpush3.bf16.msra.mxu1 %v223_v6 }
   0x8   :  { %210 = vmatprep.subr.bf16.mxu1 %v228_v0 }
   0xa   :  { %203 = vmatmul.mubr.msk.bf16.vlgmr.msra.gmra.mxu0 %vm46_vm1, %v22_v4 }
   0xb   :  { %211 = vmatpush3.bf16.msra.mxu1 %v224_v7 }
   0xc   :  { %212 = vmatprep.subr.bf16.mxu1 %v228_v0 }
   0xf   :  { %213 = vmatpush3.bf16.msra.mxu1 %v225_v8 }
  0xca   :  { %v84_v10 = vpop.f32.mrf.mxu0 }
  0xcb   :  { %v85_v11 = vadd.f32 %v180_v9, %v84_v10 }
  0xcc   :  { %v204_v12 = vpop.f32.mrf.mxu0 }
  0xcd   :  { %226 = vtanh.f32 %v85_v11 }
  0xce   :  { %v87_v13 = vpop.f32.mrf.mxu0 }
  0xd0   :  { %v205_v14 = vpop.f32.mrf.mxu0 }
  0xda   :  { %v227_v15 = vpop.eup %226 }
  0xdb   :  { %v91_v16 = vpack.c.bf16 %v227_v15, %v227_v15 }
  0xdd   :  { %215 = vmatmul.mubr.msk.bf16.vlgmr.msra.gmra.mxu1 %vm131_vm2, %v91_v16 }
 0x19d   :  { %v169_v18 = vpop.f32.mrf.mxu1 }
 0x19e   :  { %v170_v19 = vadd.f32 %v184_v17, %v169_v18 }
 0x19f   :  { %v216_v20 = vpop.f32.mrf.mxu1 }
 0x1a0   :  { %175 = vst.msk [vmem:[%s297_s5] sm:$0xff] %vm46_vm1, %v170_v19 }
 0x1a1   :  { %v172_v21 = vpop.f32.mrf.mxu1 }
 0x1a3   :  { %v217_v22 = vpop.f32.mrf.mxu1 }

</bundles_post_ra>
